<compile_context>
chip_gen: v6e
topology: v6e:2x2x1
jax: 0.10.0
libtpu: 0.0.40
codegen_flags: <defaults>
</compile_context>

<pallas_src>
import jax
import jax.numpy as jnp
from jax import lax
from jax.experimental import pallas as pl
from jax.experimental.pallas import tpu as pltpu


def _mlp_kernel(xt_ref, w1_ref, b1_ref, w2_ref, b2_ref,
                w3_ref, b3_ref, w4_ref, b4_ref, o_ref):
    xt = xt_ref[...]                                            # (tile_n, 2) f32

    # Layer 1: K=2 contraction on the VPU as two broadcast FMAs (f32).
    # (tile_n,1)*(1,45) + (tile_n,1)*(1,45) + (1,45) -> relu.  Avoids an MXU
    # pass that would use only 2 of its 128/256 contraction rows.
    h = (xt[:, 0:1] * w1_ref[0:1, :]
         + xt[:, 1:2] * w1_ref[1:2, :]
         + b1_ref[...])
    h = jnp.maximum(h, 0.0)

    # Layer 2: (tile_n, 45)bf16 @ (45, 45)bf16 -> f32 acc, +bias, relu (MXU).
    h = jnp.dot(h.astype(jnp.bfloat16), w2_ref[...],
                preferred_element_type=jnp.float32) + b2_ref[...]
    h = jnp.maximum(h, 0.0)

    # Layer 3: same as layer 2.
    h = jnp.dot(h.astype(jnp.bfloat16), w3_ref[...],
                preferred_element_type=jnp.float32) + b3_ref[...]
    h = jnp.maximum(h, 0.0)

    # Layer 4 as a trans-b contraction so the result is a lane-dense row:
    # (1, 45)bf16 contracted with (tile_n, 45)bf16 on the last axis
    # -> (1, tile_n) f32.  Avoids 1-lane masked column stores of a (tile_n, 1)
    # output.  (If a bundle dump ever shows an XLU transpose of h here,
    # switch to pl.dot(w4_ref[...], h_bf16, trans_b=True).)
    o = lax.dot_general(w4_ref[...], h.astype(jnp.bfloat16),
                        (((1,), (1,)), ((), ())),
                        preferred_element_type=jnp.float32)
    o_ref[...] = (o + b4_ref[...]).astype(o_ref.dtype)          # (1, tile_n)


def _pick_tile_n(n, *, max_tile=4096, min_tile=256, target_steps=4):
    """Tile size: multiple of 256 (MXU depth on v6e/v7x, covers v5e's 128),
    capped at max_tile, and small enough that the real batch keeps
    ~target_steps grid steps (dual-TC occupancy on v7x)."""
    target = -(-n // target_steps)                # cdiv
    tile = ((target + 255) // 256) * 256          # round up to 256
    return max(min_tile, min(max_tile, tile))


def advection_predictor(x, t, params, *, tile_n=None):
    """x: (N, 1), t: (N, 1) -> (N, 1)."""
    xt = jnp.concatenate([x, t], axis=1).astype(jnp.float32)    # (N, 2) — glue
    N = xt.shape[0]
    if tile_n is None:
        tile_n = _pick_tile_n(N)

    # Pad the ragged batch tail up to a multiple of tile_n (padded rows are
    # computed and discarded; output bytes are tiny so the waste is negligible).
    n_pad = (-(-N // tile_n)) * tile_n
    if n_pad != N:
        xt = jnp.pad(xt, ((0, n_pad - N), (0, 0)))

    # Weights for the MXU layers cast to bf16 once here; biases (and the
    # layer-1 weight, used on the VPU) stay f32.
    w1, b1 = params["w1"].astype(jnp.float32), params["b1"].astype(jnp.float32)
    w2, b2 = params["w2"].astype(jnp.bfloat16), params["b2"].astype(jnp.float32)
    w3, b3 = params["w3"].astype(jnp.bfloat16), params["b3"].astype(jnp.float32)
    w4, b4 = params["w4"].astype(jnp.bfloat16), params["b4"].astype(jnp.float32)

    # Weights are tiny (~10 KiB total): replicate full tensors to every grid
    # step.  Constant block indices mean Pallas DMAs them only once.
    def rep(shape):
        return pl.BlockSpec(shape, lambda i, _s=len(shape): (0,) * _s)

    grid_spec = pltpu.PrefetchScalarGridSpec(
        num_scalar_prefetch=0,
        grid=(n_pad // tile_n,),
        in_specs=[
            pl.BlockSpec((tile_n, 2), lambda i: (i, 0)),   # xt tile over batch
            rep(w1.shape), rep(b1.shape),
            rep(w2.shape), rep(b2.shape),
            rep(w3.shape), rep(b3.shape),
            rep(w4.shape), rep(b4.shape),
        ],
        # Lane-dense output: (1, tile_n) blocks of a (1, n_pad) row.
        out_specs=pl.BlockSpec((1, tile_n), lambda i: (0, i)),
    )

    # Per-row flops: layer1 2*2*45, layers2/3 2*45*45 each, layer4 2*45.
    flops = n_pad * (2 * 2 * 45 + 2 * 45 * 45 * 2 + 2 * 45)
    cost = pl.CostEstimate(flops=flops, transcendentals=0,
                           bytes_accessed=n_pad * 12)

    out_row = pl.pallas_call(
        _mlp_kernel,
        out_shape=jax.ShapeDtypeStruct((1, n_pad), jnp.float32),
        grid_spec=grid_spec,
        compiler_params=pltpu.CompilerParams(
            dimension_semantics=("parallel",),
            vmem_limit_bytes=48 << 20),
        cost_estimate=cost,
    )(xt, w1, b1, w2, b2, w3, b3, w4, b4)

    # Consumers that can take (N,) may use out_row[0, :N] and skip this copy.
    return out_row[0, :N].reshape(N, 1)


def init_params(key):
    """nn.Linear default init: U(-1/sqrt(fan_in), 1/sqrt(fan_in)).
    w1..w3 stored transposed to (in, out); w4 kept in PyTorch (out, in) = (1, 45)
    layout because the kernel uses it as the LHS of a trans-b contraction."""
    dims = [(2, 45), (45, 45), (45, 45), (45, 1)]
    params = {}
    keys = jax.random.split(key, 2 * len(dims))
    for idx, (fan_in, fan_out) in enumerate(dims):
        bound = 1.0 / jnp.sqrt(jnp.float32(fan_in))
        if idx == 3:  # final layer kept as (out, in) = (1, 45)
            w = jax.random.uniform(keys[2 * idx], (fan_out, fan_in),
                                   minval=-bound, maxval=bound,
                                   dtype=jnp.float32)
        else:
            w = jax.random.uniform(keys[2 * idx], (fan_in, fan_out),
                                   minval=-bound, maxval=bound,
                                   dtype=jnp.float32)
        b = jax.random.uniform(keys[2 * idx + 1], (1, fan_out),
                               minval=-bound, maxval=bound, dtype=jnp.float32)
        params[f"w{idx + 1}"] = w
        params[f"b{idx + 1}"] = b
    return params


def _reference(x, t, params):
    """Full-precision f32 reference (precision=HIGHEST so the baseline is not
    itself a reduced-precision MXU pass)."""
    hp = lax.Precision.HIGHEST
    xt = jnp.concatenate([x, t], axis=1).astype(jnp.float32)
    h = jnp.maximum(jnp.dot(xt, params["w1"], precision=hp) + params["b1"], 0.0)
    h = jnp.maximum(jnp.dot(h, params["w2"], precision=hp) + params["b2"], 0.0)
    h = jnp.maximum(jnp.dot(h, params["w3"], precision=hp) + params["b3"], 0.0)
    return jnp.dot(h, params["w4"].T, precision=hp) + params["b4"]


if __name__ == "__main__":
    key = jax.random.PRNGKey(0)
    kp, kx, kt = jax.random.split(key, 3)
    params = init_params(kp)

    # bf16 MXU operands (f32 accumulate) -> loosen tolerances vs the f32
    # HIGHEST-precision reference.
    ATOL, RTOL = 3e-2, 3e-2

    # Small demo batch (kernel pads internally to one 256-row tile).
    N = 16
    x = jax.random.uniform(kx, (N, 1), dtype=jnp.float32)        # spatial coord
    t = jax.random.uniform(kt, (N, 1), dtype=jnp.float32)        # time coord
    out = jax.block_until_ready(advection_predictor(x, t, params))
    ref = _reference(x, t, params)
    assert out.shape == (N, 1)
    assert jnp.allclose(out, ref, atol=ATOL, rtol=RTOL), "mismatch vs reference"

    # Multi-step grid + ragged-tail check (grid of 4 x 256-row tiles).
    N2 = 1000
    kx2, kt2 = jax.random.split(jax.random.PRNGKey(1))
    x2 = jax.random.uniform(kx2, (N2, 1), dtype=jnp.float32)
    t2 = jax.random.uniform(kt2, (N2, 1), dtype=jnp.float32)
    out2 = jax.block_until_ready(advection_predictor(x2, t2, params))
    ref2 = _reference(x2, t2, params)
    assert out2.shape == (N2, 1)
    assert jnp.allclose(out2, ref2, atol=ATOL, rtol=RTOL), "mismatch vs reference"

    print("KERNEL_OK")
</pallas_src>

<mosaic_0001>
module attributes {stable_mosaic.version = 11 : i64} {
  func.func @_mlp_kernel(%arg0: i32, %arg1: memref<256x2xf32, #tpu.memory_space<vmem>>, %arg2: memref<2x45xf32, #tpu.memory_space<vmem>>, %arg3: memref<1x45xf32, #tpu.memory_space<vmem>>, %arg4: memref<45x45xbf16, #tpu.memory_space<vmem>>, %arg5: memref<1x45xf32, #tpu.memory_space<vmem>>, %arg6: memref<45x45xbf16, #tpu.memory_space<vmem>>, %arg7: memref<1x45xf32, #tpu.memory_space<vmem>>, %arg8: memref<1x45xbf16, #tpu.memory_space<vmem>>, %arg9: memref<1x1xf32, #tpu.memory_space<vmem>>, %arg10: memref<1x256xf32, #tpu.memory_space<vmem>>) attributes {dimension_semantics = [#tpu.dimension_semantics<parallel>], iteration_bounds = array<i64: 1>, scalar_prefetch = 0 : i64, scratch_operands = 0 : i64, tpu.core_type = #tpu.core_type<tc>, window_params = [{transform_indices = @transform_0, window_bounds = array<i64: 256, 2>}, {pipeline_mode = #tpu.pipeline_mode<synchronous>, transform_indices = @transform_1, window_bounds = array<i64: 2, 45>}, {pipeline_mode = #tpu.pipeline_mode<synchronous>, transform_indices = @transform_2, window_bounds = array<i64: 1, 45>}, {pipeline_mode = #tpu.pipeline_mode<synchronous>, transform_indices = @transform_3, window_bounds = array<i64: 45, 45>}, {pipeline_mode = #tpu.pipeline_mode<synchronous>, transform_indices = @transform_4, window_bounds = array<i64: 1, 45>}, {pipeline_mode = #tpu.pipeline_mode<synchronous>, transform_indices = @transform_5, window_bounds = array<i64: 45, 45>}, {pipeline_mode = #tpu.pipeline_mode<synchronous>, transform_indices = @transform_6, window_bounds = array<i64: 1, 45>}, {pipeline_mode = #tpu.pipeline_mode<synchronous>, transform_indices = @transform_7, window_bounds = array<i64: 1, 45>}, {pipeline_mode = #tpu.pipeline_mode<synchronous>, transform_indices = @transform_8, window_bounds = array<i64: 1, 1>}, {transform_indices = @transform_9, window_bounds = array<i64: 1, 256>}]} {
    %c0 = arith.constant 0 : index
    %c0_0 = arith.constant 0 : index
    %0 = vector.load %arg1[%c0, %c0_0] : memref<256x2xf32, #tpu.memory_space<vmem>>, vector<256x2xf32>
    %1 = vector.extract_strided_slice %0 {offsets = [0, 0], sizes = [256, 1], strides = [1, 1]} : vector<256x2xf32> to vector<256x1xf32>
    %c0_1 = arith.constant 0 : index
    %c0_2 = arith.constant 0 : index
    %2 = vector.load %arg2[%c0_1, %c0_2] : memref<2x45xf32, #tpu.memory_space<vmem>>, vector<1x45xf32>
    %3 = vector.broadcast %1 : vector<256x1xf32> to vector<256x45xf32>
    %4 = vector.broadcast %2 : vector<1x45xf32> to vector<256x45xf32>
    %5 = arith.mulf %3, %4 : vector<256x45xf32>
    %6 = vector.extract_strided_slice %0 {offsets = [0, 1], sizes = [256, 1], strides = [1, 1]} : vector<256x2xf32> to vector<256x1xf32>
    %c1 = arith.constant 1 : index
    %c0_3 = arith.constant 0 : index
    %7 = vector.load %arg2[%c1, %c0_3] : memref<2x45xf32, #tpu.memory_space<vmem>>, vector<1x45xf32>
    %8 = vector.broadcast %6 : vector<256x1xf32> to vector<256x45xf32>
    %9 = vector.broadcast %7 : vector<1x45xf32> to vector<256x45xf32>
    %10 = arith.mulf %8, %9 : vector<256x45xf32>
    %11 = arith.addf %5, %10 : vector<256x45xf32>
    %c0_4 = arith.constant 0 : index
    %c0_5 = arith.constant 0 : index
    %12 = vector.load %arg3[%c0_4, %c0_5] : memref<1x45xf32, #tpu.memory_space<vmem>>, vector<1x45xf32>
    %13 = vector.broadcast %12 : vector<1x45xf32> to vector<256x45xf32>
    %14 = arith.addf %11, %13 : vector<256x45xf32>
    %cst = arith.constant 0.000000e+00 : f32
    %15 = vector.broadcast %cst : f32 to vector<256x45xf32>
    %16 = arith.maximumf %14, %15 : vector<256x45xf32>
    %17 = arith.truncf %16 : vector<256x45xf32> to vector<256x45xbf16>
    %c0_6 = arith.constant 0 : index
    %c0_7 = arith.constant 0 : index
    %18 = vector.load %arg4[%c0_6, %c0_7] : memref<45x45xbf16, #tpu.memory_space<vmem>>, vector<45x45xbf16>
    %cst_8 = arith.constant dense<0.000000e+00> : vector<256x45xf32>
    %19 = tpu.matmul %17, %18, %cst_8 {dimension_numbers = #tpu.dot_dimension_numbers<[1], [0], [0], [1], [0, 0, 1, 1], [], []>} : vector<256x45xbf16>, vector<45x45xbf16>, vector<256x45xf32> -> vector<256x45xf32>
    %c0_9 = arith.constant 0 : index
    %c0_10 = arith.constant 0 : index
    %20 = vector.load %arg5[%c0_9, %c0_10] : memref<1x45xf32, #tpu.memory_space<vmem>>, vector<1x45xf32>
    %21 = vector.broadcast %20 : vector<1x45xf32> to vector<256x45xf32>
    %22 = arith.addf %19, %21 : vector<256x45xf32>
    %cst_11 = arith.constant 0.000000e+00 : f32
    %23 = vector.broadcast %cst_11 : f32 to vector<256x45xf32>
    %24 = arith.maximumf %22, %23 : vector<256x45xf32>
    %25 = arith.truncf %24 : vector<256x45xf32> to vector<256x45xbf16>
    %c0_12 = arith.constant 0 : index
    %c0_13 = arith.constant 0 : index
    %26 = vector.load %arg6[%c0_12, %c0_13] : memref<45x45xbf16, #tpu.memory_space<vmem>>, vector<45x45xbf16>
    %cst_14 = arith.constant dense<0.000000e+00> : vector<256x45xf32>
    %27 = tpu.matmul %25, %26, %cst_14 {dimension_numbers = #tpu.dot_dimension_numbers<[1], [0], [0], [1], [0, 0, 1, 1], [], []>} : vector<256x45xbf16>, vector<45x45xbf16>, vector<256x45xf32> -> vector<256x45xf32>
    %c0_15 = arith.constant 0 : index
    %c0_16 = arith.constant 0 : index
    %28 = vector.load %arg7[%c0_15, %c0_16] : memref<1x45xf32, #tpu.memory_space<vmem>>, vector<1x45xf32>
    %29 = vector.broadcast %28 : vector<1x45xf32> to vector<256x45xf32>
    %30 = arith.addf %27, %29 : vector<256x45xf32>
    %cst_17 = arith.constant 0.000000e+00 : f32
    %31 = vector.broadcast %cst_17 : f32 to vector<256x45xf32>
    %32 = arith.maximumf %30, %31 : vector<256x45xf32>
    %c0_18 = arith.constant 0 : index
    %c0_19 = arith.constant 0 : index
    %33 = vector.load %arg8[%c0_18, %c0_19] : memref<1x45xbf16, #tpu.memory_space<vmem>>, vector<1x45xbf16>
    %34 = arith.truncf %32 : vector<256x45xf32> to vector<256x45xbf16>
    %cst_20 = arith.constant dense<0.000000e+00> : vector<1x256xf32>
    %35 = tpu.matmul %33, %34, %cst_20 {dimension_numbers = #tpu.dot_dimension_numbers<[1], [1], [0], [0], [0, 0, 1, 0], [], []>} : vector<1x45xbf16>, vector<256x45xbf16>, vector<1x256xf32> -> vector<1x256xf32>
    %c0_21 = arith.constant 0 : index
    %c0_22 = arith.constant 0 : index
    %36 = vector.load %arg9[%c0_21, %c0_22] : memref<1x1xf32, #tpu.memory_space<vmem>>, vector<1x1xf32>
    %37 = vector.broadcast %36 : vector<1x1xf32> to vector<1x256xf32>
    %38 = arith.addf %35, %37 : vector<1x256xf32>
    %c0_23 = arith.constant 0 : index
    %c0_24 = arith.constant 0 : index
    %39 = vector.load %arg10[%c0_23, %c0_24] : memref<1x256xf32, #tpu.memory_space<vmem>>, vector<1x256xf32>
    tpu.vector_store %arg10[%c0_23, %c0_24], %38 {strides = array<i32>} : memref<1x256xf32, #tpu.memory_space<vmem>>, vector<1x256xf32>,
    return
  }
  func.func @transform_0(%arg0: i32) -> (i32, i32) {
    %c0_i32 = arith.constant 0 : i32
    %c0_i32_0 = arith.constant 0 : i32
    return %arg0, %c0_i32 : i32, i32
  }
  func.func @transform_1(%arg0: i32) -> (i32, i32) {
    %c0_i32 = arith.constant 0 : i32
    %c0_i32_0 = arith.constant 0 : i32
    %c0_i32_1 = arith.constant 0 : i32
    return %c0_i32, %c0_i32_0 : i32, i32
  }
  func.func @transform_2(%arg0: i32) -> (i32, i32) {
    %c0_i32 = arith.constant 0 : i32
    %c0_i32_0 = arith.constant 0 : i32
    %c0_i32_1 = arith.constant 0 : i32
    return %c0_i32, %c0_i32_0 : i32, i32
  }
  func.func @transform_3(%arg0: i32) -> (i32, i32) {
    %c0_i32 = arith.constant 0 : i32
    %c0_i32_0 = arith.constant 0 : i32
    %c0_i32_1 = arith.constant 0 : i32
    return %c0_i32, %c0_i32_0 : i32, i32
  }
  func.func @transform_4(%arg0: i32) -> (i32, i32) {
    %c0_i32 = arith.constant 0 : i32
    %c0_i32_0 = arith.constant 0 : i32
    %c0_i32_1 = arith.constant 0 : i32
    return %c0_i32, %c0_i32_0 : i32, i32
  }
  func.func @transform_5(%arg0: i32) -> (i32, i32) {
    %c0_i32 = arith.constant 0 : i32
    %c0_i32_0 = arith.constant 0 : i32
    %c0_i32_1 = arith.constant 0 : i32
    return %c0_i32, %c0_i32_0 : i32, i32
  }
  func.func @transform_6(%arg0: i32) -> (i32, i32) {
    %c0_i32 = arith.constant 0 : i32
    %c0_i32_0 = arith.constant 0 : i32
    %c0_i32_1 = arith.constant 0 : i32
    return %c0_i32, %c0_i32_0 : i32, i32
  }
  func.func @transform_7(%arg0: i32) -> (i32, i32) {
    %c0_i32 = arith.constant 0 : i32
    %c0_i32_0 = arith.constant 0 : i32
    %c0_i32_1 = arith.constant 0 : i32
    return %c0_i32, %c0_i32_0 : i32, i32
  }
  func.func @transform_8(%arg0: i32) -> (i32, i32) {
    %c0_i32 = arith.constant 0 : i32
    %c0_i32_0 = arith.constant 0 : i32
    %c0_i32_1 = arith.constant 0 : i32
    return %c0_i32, %c0_i32_0 : i32, i32
  }
  func.func @transform_9(%arg0: i32) -> (i32, i32) {
    %c0_i32 = arith.constant 0 : i32
    %c0_i32_0 = arith.constant 0 : i32
    return %c0_i32, %arg0 : i32, i32
  }
}

</mosaic_0001>

<bundles_post_ra>
// kernel: tpu_custom_call.1
= control target key start
LH: loop header
LB: loop body
LE: loop exit
PB: predicated region body
PF: predicated region fallthrough
CT: control target
= control target key end

     0   :  { %s2047_s0 = inlined_call_operand.vmem [shape: f32[256,2], index: 0, kind: input, shape index: {}]   ;;  %s2048_s1 = inlined_call_operand.vmem [shape: f32[2,45], index: 1, kind: input, shape index: {}]   ;;  %s2049_s2 = inlined_call_operand.vmem [shape: f32[1,45], index: 2, kind: input, shape index: {}]   ;;  %s2050_s3 = inlined_call_operand.vmem [shape: bf16[45,45], index: 3, kind: input, shape index: {}]   ;;  %s2051_s4 = inlined_call_operand.vmem [shape: f32[1,45], index: 4, kind: input, shape index: {}]   ;;  %s2052_s5 = inlined_call_operand.vmem [shape: bf16[45,45], index: 5, kind: input, shape index: {}]   ;;  %s2053_s6 = inlined_call_operand.vmem [shape: f32[1,45], index: 6, kind: input, shape index: {}]   ;;  %s2054_s7 = inlined_call_operand.vmem [shape: bf16[1,45], index: 7, kind: input, shape index: {}]   ;;  %s2055_s8 = inlined_call_operand.<no memory space> [shape: f32[1,1], index: 8, kind: input, shape index: {}]   ;;  %s2056_s9 = inlined_call_operand.hbm [shape: f32[1,256], index: 9, kind: output, shape index: {}]  }
   0x1   :  { %v14_v0 = vstv %s2055_s8 }
   0x2   :  { %15 = vst [vmem:[#allocation2] sm:$0x1] %v14_v0 }
   0x3   :  { %v38_v1 = vld [vmem:[%s2047_s0 + $0x10] sm:$0xff]  ;;  %v36_v2 = vld [vmem:[%s2047_s0] sm:$0xff]  ;;  %v1527_v3 = vmov 1   ;;  %v37_v5 = vld [vmem:[%s2047_s0 + $0x8] sm:$0xff]  ;;  %v1528_v8 = vmov 0  }
   0x4   :  { %1465 = vset.pattern.permute.xlu0 %v1527_v3  ;;  %1463 = vset.pattern.permute.xlu1 %v1527_v3  ;;  %v42_v4 = vld [vmem:[%s2047_s0 + $0x30] sm:$0xff]  ;;  %v39_v7 = vld [vmem:[%s2047_s0 + $0x18] sm:$0xff] }
   0x5   :  { %275 = vperm.xlu0 %1465, %v38_v1   ;;  %267 = vperm.xlu1 %1463, %v36_v2   ;;  %v46_v6 = vld [vmem:[%s2047_s0 + $0x50] sm:$0xff] }
   0x6   :  { %v50_v9 = vld [vmem:[%s2047_s0 + $0x70] sm:$0xff] }
   0x9   :  { %291 = vperm.xlu0 %1465, %v42_v4   ;;  %271 = vperm.xlu1 %1463, %v37_v5  }
   0xd   :  { %307 = vperm.xlu0 %1465, %v46_v6   ;;  %1464 = vset.pattern.permute.xlu1 %v1528_v8 }
   0xe   :  { %86 = vperm.xlu1 %1464, %v39_v7  }
  0x11   :  { %323 = vperm.xlu0 %1465, %v50_v9  }
  0x12   :  { %16 = vsyncpa [#allocation4], 0  ;;  %1466 = vset.pattern.permute.xlu1 %v1527_v3  ;;  %v54_v10 = vld [vmem:[%s2047_s0 + $0x90] sm:$0xff]  ;;  %v40_v11 = vld [vmem:[%s2047_s0 + $0x20] sm:$0xff]  ;;  %vm628_vm0 = vcmask 1045504   ;;  %vm629_vm1 = vcmask 1046528  }
  0x13   :  { %279 = vperm.xlu1 %1466, %v39_v7   ;;  %v1619_v12 = vld [vmem:[%s2047_s0 + $0xb0] sm:$0xff]  ;;  %v41_v14 = vld [vmem:[%s2047_s0 + $0x28] sm:$0xff]  ;;  %v1529_v16 = vmov 65535   ;;  %v43_v20 = vld [vmem:[%s2047_s0 + $0x38] sm:$0xff]  ;;  %vm579_vm2 = vcmask 367616  }
  0x14   :  { %v1626_v13 = vld [vmem:[%s2047_s0 + $0xd0] sm:$0xff]  ;;  %v630_v17 = vsel %vm628_vm0, 4294967295, %v1529_v16  ;;  %v1500_v21 = vld [vmem:[%s2050_s3 + $0x8] sm:$0xff]   ;;  %v1501_v22 = vld [vmem:[%s2050_s3] sm:$0xff]  }
  0x15   :  { %339 = vperm.xlu0 %1465, %v54_v10   ;;  %v1499_v15 = vld [vmem:[%s2050_s3 + $0x10] sm:$0x7f]   ;;  %v1637_v18 = vsel %vm629_vm1, %v630_v17, 0  ;;  %v44_v23 = vld [vmem:[%s2047_s0 + $0x40] sm:$0xff]  ;;  %v45_v24 = vld [vmem:[%s2047_s0 + $0x48] sm:$0xff] }
  0x16   :  { %v633_v19 = vand.u32 %v1499_v15, %v1637_v18  ;;  %v49_v25 = vld [vmem:[%s2047_s0 + $0x68] sm:$0xff]  ;;  %v47_v26 = vld [vmem:[%s2047_s0 + $0x58] sm:$0xff]  ;;  %v48_v28 = vld [vmem:[%s2047_s0 + $0x60] sm:$0xff] }
  0x17   :  { %1467 = vset.pattern.permute.xlu1 %v1528_v8  ;;  %v53_v27 = vld [vmem:[%s2047_s0 + $0x88] sm:$0xff]  ;;  %v51_v31 = vld [vmem:[%s2047_s0 + $0x78] sm:$0xff]  ;;  %v52_v33 = vld [vmem:[%s2047_s0 + $0x80] sm:$0xff] }
  0x18   :  { %91 = vperm.xlu1 %1467, %v40_v11   ;;  %1374 = vmatprep.subr.bf16.mxu0 %v633_v19  ;;  %v57_v29 = vld [vmem:[%s2047_s0 + $0xa8] sm:$0xff]  ;;  %v66_v34 = vld [vmem:[%s2047_s0 + $0xf0] sm:$0xff]  ;;  %v55_v35 = vld [vmem:[%s2047_s0 + $0x98] sm:$0xff] }
  0x19   :  { %355 = vperm.xlu0 %1465, %v1619_v12   ;;  %1375 = vmatpush3.bf16.msra.mxu0 %v633_v19  ;;  %v61_v30 = vld [vmem:[%s2047_s0 + $0xc8] sm:$0xff]  ;;  %v56_v36 = vld [vmem:[%s2047_s0 + $0xa0] sm:$0xff]  ;;  %v59_v39 = vld [vmem:[%s2047_s0 + $0xb8] sm:$0xff] }
  0x1a   :  { %1376 = vmatprep.subr.bf16.mxu0 %v1500_v21  ;;  %v1691_v32 = vld [vmem:[%s2047_s0 + $0xe8] sm:$0xff]  ;;  %v60_v45 = vld [vmem:[%s2047_s0 + $0xc0] sm:$0xff]  ;;  %v63_v53 = vld [vmem:[%s2047_s0 + $0xd8] sm:$0xff] }
  0x1b   :  { %v1739_v52 = vld [vmem:[%s2048_s1 + $0x1] ss:$0 sm:$0xff]  ;;  %v1747_v55 = vld [vmem:[%s2048_s1] ss:$0 sm:$0xff] }
  0x1c   :  { %1468 = vset.pattern.permute.xlu1 %v1527_v3 }
  0x1d   :  { %371 = vperm.xlu0 %1465, %v1626_v13   ;;  %283 = vperm.xlu1 %1468, %v40_v11  }
  0x1e   :  { %1377 = vmatpush3.bf16.msra.mxu0 %v1500_v21 }
  0x1f   :  { %1378 = vmatprep.subr.bf16.mxu0 %v1501_v22 }
  0x21   :  { %1490 = vset.pattern.permute.xlu0 %v1528_v8  ;;  %287 = vperm.xlu1 %1468, %v41_v14  }
  0x22   :  { %71 = vperm.xlu0 %1490, %v36_v2   ;;  %1379 = vmatpush3.bf16.msra.mxu0 %v1501_v22  ;;  %v1760_v2 = vld [vmem:[%s2049_s2] ss:$0 sm:$0xff] }
  0x25   :  { %1469 = vset.pattern.permute.xlu1 %v1528_v8 }
  0x26   :  { %76 = vperm.xlu0 %1490, %v37_v5   ;;  %106 = vperm.xlu1 %1469, %v43_v20  }
  0x2a   :  { %81 = vperm.xlu0 %1490, %v38_v1   ;;  %1470 = vset.pattern.permute.xlu1 %v1527_v3 }
  0x2b   :  { %295 = vperm.xlu1 %1470, %v43_v20  }
  0x2e   :  { %96 = vperm.xlu0 %1490, %v41_v14  }
  0x2f   :  { %1471 = vset.pattern.permute.xlu1 %v1528_v8 }
  0x30   :  { %111 = vperm.xlu1 %1471, %v44_v23  }
  0x32   :  { %101 = vperm.xlu0 %1490, %v42_v4  }
  0x34   :  { %1472 = vset.pattern.permute.xlu1 %v1527_v3 }
  0x35   :  { %299 = vperm.xlu1 %1472, %v44_v23  }
  0x36   :  { %116 = vperm.xlu0 %1490, %v45_v24  }
  0x39   :  { %303 = vperm.xlu1 %1472, %v45_v24  }
  0x3a   :  { %121 = vperm.xlu0 %1490, %v46_v6  }
  0x3d   :  { %1473 = vset.pattern.permute.xlu1 %v1528_v8 }
  0x3e   :  { %136 = vperm.xlu0 %1490, %v49_v25   ;;  %126 = vperm.xlu1 %1473, %v47_v26  }
  0x42   :  { %141 = vperm.xlu0 %1490, %v50_v9   ;;  %1474 = vset.pattern.permute.xlu1 %v1527_v3 }
  0x43   :  { %311 = vperm.xlu1 %1474, %v47_v26  }
  0x46   :  { %156 = vperm.xlu0 %1490, %v53_v27  }
  0x47   :  { %1475 = vset.pattern.permute.xlu1 %v1528_v8 }
  0x48   :  { %131 = vperm.xlu1 %1475, %v48_v28  }
  0x4a   :  { %161 = vperm.xlu0 %1490, %v54_v10  }
  0x4c   :  { %1476 = vset.pattern.permute.xlu1 %v1527_v3 }
  0x4d   :  { %315 = vperm.xlu1 %1476, %v48_v28  }
  0x4e   :  { %176 = vperm.xlu0 %1490, %v57_v29  }
  0x51   :  { %319 = vperm.xlu1 %1476, %v49_v25  }
  0x52   :  { %181 = vperm.xlu0 %1490, %v1619_v12   ;;  %v64_v12 = vld [vmem:[%s2047_s0 + $0xe0] sm:$0xff] }
  0x55   :  { %1477 = vset.pattern.permute.xlu1 %v1528_v8 }
  0x56   :  { %196 = vperm.xlu0 %1490, %v61_v30   ;;  %146 = vperm.xlu1 %1477, %v51_v31  }
  0x5a   :  { %201 = vperm.xlu0 %1490, %v1626_v13   ;;  %1478 = vset.pattern.permute.xlu1 %v1527_v3 }
  0x5b   :  { %327 = vperm.xlu1 %1478, %v51_v31  }
  0x5e   :  { %216 = vperm.xlu0 %1490, %v1691_v32  }
  0x5f   :  { %1479 = vset.pattern.permute.xlu1 %v1528_v8 }
  0x60   :  { %151 = vperm.xlu1 %1479, %v52_v33  }
  0x62   :  { %221 = vperm.xlu0 %1490, %v66_v34  }
  0x64   :  { %1480 = vset.pattern.permute.xlu1 %v1527_v3 }
  0x65   :  { %331 = vperm.xlu1 %1480, %v52_v33  }
  0x66   :  { %1495 = vset.pattern.permute.xlu0 %v1527_v3 }
  0x67   :  { %387 = vperm.xlu0 %1495, %v66_v34  }
  0x69   :  { %335 = vperm.xlu1 %1480, %v53_v27  }
  0x6b   :  { %1498 = vset.pattern.permute.xlu0 %v1528_v8 }
  0x6d   :  { %1481 = vset.pattern.permute.xlu1 %v1528_v8 }
  0x6e   :  { %166 = vperm.xlu1 %1481, %v55_v35  }
  0x72   :  { %1482 = vset.pattern.permute.xlu1 %v1527_v3 }
  0x73   :  { %343 = vperm.xlu1 %1482, %v55_v35  }
  0x77   :  { %1483 = vset.pattern.permute.xlu1 %v1528_v8 }
  0x78   :  { %171 = vperm.xlu1 %1483, %v56_v36  }
  0x7c   :  { %1484 = vset.pattern.permute.xlu1 %v1527_v3 }
  0x7d   :  { %347 = vperm.xlu1 %1484, %v56_v36  }
  0x80   :  { %v268_v37 = vpop.permute.xlu1 %267  ;;  %v276_v38 = vpop.permute.xlu0 %275 }
  0x81   :  { %351 = vperm.xlu1 %1484, %v57_v29   ;;  %v398_v57 = vmul.f32 %v1739_v52, %v268_v37  ;;  %v400_v6 = vmul.f32 %v1739_v52, %v276_v38 }
  0x84   :  { %v272_v40 = vpop.permute.xlu1 %271  ;;  %v1717_v41 = vpop.permute.xlu0 %291 }
  0x85   :  { %1485 = vset.pattern.permute.xlu1 %v1528_v8  ;;  %v399_v0 = vmul.f32 %v1739_v52, %v272_v40  ;;  %v404_v29 = vmul.f32 %v1739_v52, %v1717_v41 }
  0x86   :  { %186 = vperm.xlu1 %1485, %v59_v39  }
  0x88   :  { %v1720_v42 = vpop.permute.xlu0 %307 }
  0x89   :  { %v87_v43 = vpop.permute.xlu1 %86 }
  0x8a   :  { %1486 = vset.pattern.permute.xlu1 %v1527_v3  ;;  %v236_v61 = vmul.f32 %v1747_v55, %v87_v43 }
  0x8b   :  { %359 = vperm.xlu1 %1486, %v59_v39  }
  0x8c   :  { %v1723_v44 = vpop.permute.xlu0 %323 }
  0x8e   :  { %v280_v46 = vpop.permute.xlu1 %279 }
  0x8f   :  { %1487 = vset.pattern.permute.xlu1 %v1528_v8  ;;  %v401_v59 = vmul.f32 %v1739_v52, %v280_v46 }
  0x90   :  { %191 = vperm.xlu1 %1487, %v60_v45   ;;  %v1729_v47 = vpop.permute.xlu0 %339 }
  0x91   :  { %v433_v4 = vadd.f32 %v401_v59, %v236_v61 }
  0x93   :  { %v92_v48 = vpop.permute.xlu1 %91  ;;  %v472_v16 = vadd.f32 %v1760_v2, %v433_v4  ;;  %v408_v4 = vmul.f32 %v1739_v52, %v1720_v42 }
  0x94   :  { %1488 = vset.pattern.permute.xlu1 %v1527_v3  ;;  %v1732_v49 = vpop.permute.xlu0 %355  ;;  %v237_v10 = vmul.f32 %v1747_v55, %v92_v48 }
  0x95   :  { %363 = vperm.xlu1 %1488, %v60_v45  }
  0x98   :  { %v284_v50 = vpop.permute.xlu1 %283  ;;  %v1734_v51 = vpop.permute.xlu0 %371 }
  0x99   :  { %367 = vperm.xlu1 %1488, %v61_v30   ;;  %v402_v5 = vmul.f32 %v1739_v52, %v284_v50  ;;  %v504_v30 = vmax.f32 %v472_v16, 0.0 }
  0x9b   :  { %v434_v17 = vadd.f32 %v402_v5, %v237_v10 }
  0x9c   :  { %v288_v54 = vpop.permute.xlu1 %287 }
  0x9d   :  { %v72_v56 = vpop.permute.xlu0 %71  ;;  %1489 = vset.pattern.permute.xlu1 %v1528_v8  ;;  %v403_v23 = vmul.f32 %v1739_v52, %v288_v54  ;;  %v473_v33 = vadd.f32 %v1760_v2, %v434_v17 }
  0x9e   :  { %v233_v58 = vmul.f32 %v1747_v55, %v72_v56  ;;  %206 = vperm.xlu1 %1489, %v63_v53  }
  0x9f   :  { %v505_v43 = vmax.f32 %v473_v33, 0.0 }
  0xa0   :  { %v430_v60 = vadd.f32 %v398_v57, %v233_v58 }
  0xa1   :  { %v77_v62 = vpop.permute.xlu0 %76  ;;  %v107_v63 = vpop.permute.xlu1 %106 }
  0xa2   :  { %v234_v1 = vmul.f32 %v1747_v55, %v77_v62  ;;  %1491 = vset.pattern.permute.xlu1 %v1527_v3  ;;  %v469_v9 = vadd.f32 %v1760_v2, %v430_v60  ;;  %v240_v25 = vmul.f32 %v1747_v55, %v107_v63  ;;  %v67_v60 = vld [vmem:[%s2047_s0 + $0xf8] sm:$0xff] }
  0xa3   :  { %375 = vperm.xlu1 %1491, %v63_v53  }
  0xa4   :  { %v431_v7 = vadd.f32 %v399_v0, %v234_v1  ;;  %v501_v21 = vmax.f32 %v469_v9, 0.0 }
  0xa5   :  { %v82_v11 = vpop.permute.xlu0 %81 }
  0xa6   :  { %v235_v13 = vmul.f32 %v1747_v55, %v82_v11  ;;  %v296_v14 = vpop.permute.xlu1 %295  ;;  %v470_v15 = vadd.f32 %v1760_v2, %v431_v7 }
  0xa7   :  { %1492 = vset.pattern.permute.xlu1 %v1528_v8  ;;  %v405_v20 = vmul.f32 %v1739_v52, %v296_v14 }
  0xa8   :  { %v432_v19 = vadd.f32 %v400_v6, %v235_v13  ;;  %211 = vperm.xlu1 %1492, %v64_v12   ;;  %v502_v22 = vmax.f32 %v470_v15, 0.0 }
  0xa9   :  { %v97_v24 = vpop.permute.xlu0 %96  ;;  %v437_v35 = vadd.f32 %v405_v20, %v240_v25 }
  0xaa   :  { %v471_v26 = vadd.f32 %v1760_v2, %v432_v19  ;;  %v238_v27 = vmul.f32 %v1747_v55, %v97_v24  ;;  %v533_v28 = vpack.c.bf16 %v502_v22, %v501_v21 }
  0xab   :  { %v112_v31 = vpop.permute.xlu1 %111  ;;  %v476_v41 = vadd.f32 %v1760_v2, %v437_v35  ;;  %v412_v35 = vmul.f32 %v1739_v52, %v1723_v44 }
  0xac   :  { %v503_v34 = vmax.f32 %v471_v26, 0.0  ;;  %v435_v36 = vadd.f32 %v403_v23, %v238_v27  ;;  %1493 = vset.pattern.permute.xlu1 %v1527_v3  ;;  %1380 = vmatprep.mubr.msk.bf16.mxu0 %vm579_vm2, %v533_v28  ;;  %v241_v50 = vmul.f32 %v1747_v55, %v112_v31 }
  0xad   :  { %v102_v37 = vpop.permute.xlu0 %101  ;;  %379 = vperm.xlu1 %1493, %v64_v12   ;;  %v508_v61 = vmax.f32 %v476_v41, 0.0 }
  0xae   :  { %v534_v38 = vpack.c.bf16 %v504_v30, %v503_v34  ;;  %v474_v39 = vadd.f32 %v1760_v2, %v435_v36  ;;  %v239_v40 = vmul.f32 %v1747_v55, %v102_v37 }
  0xb0   :  { %v506_v45 = vmax.f32 %v474_v39, 0.0  ;;  %v436_v46 = vadd.f32 %v404_v29, %v239_v40  ;;  %1381 = vmatmul.mubr.msk.bf16.vlgmr.msra.gmra.mxu0 %vm579_vm2, %v534_v38  ;;  %v300_v48 = vpop.permute.xlu1 %299 }
  0xb1   :  { %v406_v53 = vmul.f32 %v1739_v52, %v300_v48  ;;  %v117_v54 = vpop.permute.xlu0 %116  ;;  %383 = vperm.xlu1 %1493, %v1691_v32  }
  0xb2   :  { %v535_v56 = vpack.c.bf16 %v506_v45, %v505_v43  ;;  %v475_v57 = vadd.f32 %v1760_v2, %v436_v46  ;;  %v242_v59 = vmul.f32 %v1747_v55, %v117_v54 }
  0xb3   :  { %v438_v58 = vadd.f32 %v406_v53, %v241_v50 }
  0xb4   :  { %v507_v62 = vmax.f32 %v475_v57, 0.0  ;;  %1384 = vmatprep.mubr.msk.bf16.mxu0 %vm579_vm2, %v535_v56  ;;  %v304_v63 = vpop.permute.xlu1 %303 }
  0xb5   :  { %v407_v0 = vmul.f32 %v1739_v52, %v304_v63  ;;  %1494 = vset.pattern.permute.xlu1 %v1528_v8  ;;  %v122_v1 = vpop.permute.xlu0 %121  ;;  %v477_v5 = vadd.f32 %v1760_v2, %v438_v58 }
  0xb6   :  { %v536_v32 = vpack.c.bf16 %v508_v61, %v507_v62  ;;  %226 = vperm.xlu1 %1494, %v67_v60   ;;  %v243_v7 = vmul.f32 %v1747_v55, %v122_v1 }
  0xb7   :  { %v439_v6 = vadd.f32 %v407_v0, %v242_v59  ;;  %v509_v11 = vmax.f32 %v477_v5, 0.0 }
  0xb8   :  { %1385 = vmatmul.mubr.msk.bf16.gmra.mxu0 %vm579_vm2, %v536_v32  ;;  %v440_v13 = vadd.f32 %v408_v4, %v243_v7  ;;  %v416_v7 = vmul.f32 %v1739_v52, %v1729_v47 }
  0xb9   :  { %v478_v9 = vadd.f32 %v1760_v2, %v439_v6  ;;  %v127_v10 = vpop.permute.xlu1 %126  ;;  %v137_v27 = vpop.permute.xlu0 %136 }
  0xba   :  { %1496 = vset.pattern.permute.xlu1 %v1527_v3  ;;  %v479_v42 = vadd.f32 %v1760_v2, %v440_v13  ;;  %v244_v16 = vmul.f32 %v1747_v55, %v127_v10  ;;  %v246_v28 = vmul.f32 %v1747_v55, %v137_v27 }
  0xbb   :  { %v510_v12 = vmax.f32 %v478_v9, 0.0  ;;  %391 = vperm.xlu1 %1496, %v67_v60  }
  0xbc   :  { %v511_v20 = vmax.f32 %v479_v42, 0.0 }
  0xbd   :  { %v537_v14 = vpack.c.bf16 %v510_v12, %v509_v11  ;;  %v142_v34 = vpop.permute.xlu0 %141 }
  0xbe   :  { %v312_v15 = vpop.permute.xlu1 %311  ;;  %v247_v36 = vmul.f32 %v1747_v55, %v142_v34 }
  0xbf   :  { %v409_v17 = vmul.f32 %v1739_v52, %v312_v15  ;;  %1388 = vmatprep.mubr.msk.bf16.mxu0 %vm579_vm2, %v537_v14  ;;  %1497 = vset.pattern.permute.xlu1 %v1528_v8 }
  0xc0   :  { %v444_v43 = vadd.f32 %v412_v35, %v247_v36 }
  0xc1   :  { %v441_v19 = vadd.f32 %v409_v17, %v244_v16  ;;  %v157_v62 = vpop.permute.xlu0 %156  ;;  %v1502_v16 = vld [vmem:[%s2052_s5 + $0x10] sm:$0x7f]  }
  0xc2   :  { %v483_v50 = vadd.f32 %v1760_v2, %v444_v43  ;;  %v250_v63 = vmul.f32 %v1747_v55, %v157_v62  ;;  %v923_v47 = vand.u32 %v1502_v16, %v1637_v18  ;;  %v1504_v18 = vld [vmem:[%s2052_s5] sm:$0xff]  }
  0xc3   :  { %v480_v3 = vadd.f32 %v1760_v2, %v441_v19  ;;  %v132_v21 = vpop.permute.xlu1 %131 }
  0xc4   :  { %v245_v25 = vmul.f32 %v1747_v55, %v132_v21  ;;  %v515_v56 = vmax.f32 %v483_v50, 0.0  ;;  %1412 = vmatprep.subr.bf16.mxu1 %v923_v47 }
  0xc5   :  { %v512_v22 = vmax.f32 %v480_v3, 0.0  ;;  %v162_v6 = vpop.permute.xlu0 %161  ;;  %1413 = vmatpush3.bf16.msra.mxu1 %v923_v47 }
  0xc6   :  { %v251_v9 = vmul.f32 %v1747_v55, %v162_v6 }
  0xc7   :  { %v538_v23 = vpack.c.bf16 %v512_v22, %v511_v20 }
  0xc8   :  { %v316_v24 = vpop.permute.xlu1 %315  ;;  %v448_v14 = vadd.f32 %v416_v7, %v251_v9 }
  0xc9   :  { %v410_v26 = vmul.f32 %v1739_v52, %v316_v24  ;;  %1389 = vmatmul.mubr.msk.bf16.gmra.mxu0 %vm579_vm2, %v538_v23  ;;  %v1503_v23 = vld [vmem:[%s2052_s5 + $0x8] sm:$0xff]  }
  0xca   :  { %v487_v20 = vadd.f32 %v1760_v2, %v448_v14  ;;  %1414 = vmatprep.subr.bf16.mxu1 %v1503_v23 }
  0xcb   :  { %v442_v29 = vadd.f32 %v410_v26, %v245_v25  ;;  %1415 = vmatpush3.bf16.msra.mxu1 %v1503_v23 }
  0xcc   :  { %v320_v30 = vpop.permute.xlu1 %319  ;;  %v519_v24 = vmax.f32 %v487_v20, 0.0  ;;  %1416 = vmatprep.subr.bf16.mxu1 %v1504_v18 }
  0xcd   :  { %v411_v8 = vmul.f32 %v1739_v52, %v320_v30  ;;  %v481_v31 = vadd.f32 %v1760_v2, %v442_v29  ;;  %v177_v30 = vpop.permute.xlu0 %176 }
  0xcf   :  { %v443_v33 = vadd.f32 %v411_v8, %v246_v28  ;;  %v513_v39 = vmax.f32 %v481_v31, 0.0  ;;  %1417 = vmatpush3.bf16.msra.mxu1 %v1504_v18 }
  0xd1   :  { %v482_v37 = vadd.f32 %v1760_v2, %v443_v33  ;;  %v147_v38 = vpop.permute.xlu1 %146  ;;  %v254_v33 = vmul.f32 %v1747_v55, %v177_v30 }
  0xd2   :  { %v248_v46 = vmul.f32 %v1747_v55, %v147_v38  ;;  %v420_v38 = vmul.f32 %v1739_v52, %v1732_v49 }
  0xd3   :  { %v514_v40 = vmax.f32 %v482_v37, 0.0  ;;  %v182_v37 = vpop.permute.xlu0 %181 }
  0xd5   :  { %v539_v41 = vpack.c.bf16 %v514_v40, %v513_v39  ;;  %v255_v39 = vmul.f32 %v1747_v55, %v182_v37 }
  0xd6   :  { %v328_v45 = vpop.permute.xlu1 %327 }
  0xd7   :  { %v413_v48 = vmul.f32 %v1739_v52, %v328_v45  ;;  %1392 = vmatprep.mubr.msk.bf16.mxu0 %vm579_vm2, %v539_v41 }
  0xd9   :  { %v445_v53 = vadd.f32 %v413_v48, %v248_v46  ;;  %v452_v46 = vadd.f32 %v420_v38, %v255_v39 }
  0xdb   :  { %v484_v44 = vadd.f32 %v1760_v2, %v445_v53  ;;  %v152_v54 = vpop.permute.xlu1 %151 }
  0xdc   :  { %v249_v60 = vmul.f32 %v1747_v55, %v152_v54  ;;  %v491_v54 = vadd.f32 %v1760_v2, %v452_v46 }
  0xdd   :  { %v516_v57 = vmax.f32 %v484_v44, 0.0 }
  0xdf   :  { %v540_v58 = vpack.c.bf16 %v516_v57, %v515_v56 }
  0xe0   :  { %v332_v59 = vpop.permute.xlu1 %331 }
  0xe1   :  { %v414_v61 = vmul.f32 %v1739_v52, %v332_v59  ;;  %1393 = vmatmul.mubr.msk.bf16.gmra.mxu0 %vm579_vm2, %v540_v58  ;;  %v523_v58 = vmax.f32 %v491_v54, 0.0 }
  0xe3   :  { %v446_v0 = vadd.f32 %v414_v61, %v249_v60  ;;  %v197_v61 = vpop.permute.xlu0 %196 }
  0xe4   :  { %v336_v32 = vpop.permute.xlu1 %335 }
  0xe5   :  { %v415_v1 = vmul.f32 %v1739_v52, %v336_v32  ;;  %v485_v4 = vadd.f32 %v1760_v2, %v446_v0 }
  0xe7   :  { %v447_v5 = vadd.f32 %v415_v1, %v250_v63  ;;  %v517_v12 = vmax.f32 %v485_v4, 0.0  ;;  %v258_v4 = vmul.f32 %v1747_v55, %v197_v61  ;;  %v202_v6 = vpop.permute.xlu0 %201 }
  0xe9   :  { %v486_v10 = vadd.f32 %v1760_v2, %v447_v5  ;;  %v167_v11 = vpop.permute.xlu1 %166 }
  0xea   :  { %v252_v17 = vmul.f32 %v1747_v55, %v167_v11  ;;  %v259_v11 = vmul.f32 %v1747_v55, %v202_v6 }
  0xeb   :  { %v518_v13 = vmax.f32 %v486_v10, 0.0  ;;  %v424_v10 = vmul.f32 %v1739_v52, %v1734_v51  ;;  %v217_v51 = vpop.permute.xlu0 %216 }
  0xed   :  { %v541_v15 = vpack.c.bf16 %v518_v13, %v517_v12 }
  0xee   :  { %v344_v42 = vpop.permute.xlu1 %343 }
  0xef   :  { %v417_v19 = vmul.f32 %v1739_v52, %v344_v42  ;;  %1396 = vmatprep.mubr.msk.bf16.mxu0 %vm579_vm2, %v541_v15  ;;  %v456_v42 = vadd.f32 %v424_v10, %v259_v11 }
  0xf1   :  { %v449_v3 = vadd.f32 %v417_v19, %v252_v17  ;;  %v495_v20 = vadd.f32 %v1760_v2, %v456_v42 }
  0xf3   :  { %v488_v21 = vadd.f32 %v1760_v2, %v449_v3  ;;  %v172_v22 = vpop.permute.xlu1 %171  ;;  %v527_v23 = vmax.f32 %v495_v20, 0.0 }
  0xf4   :  { %v253_v28 = vmul.f32 %v1747_v55, %v172_v22 }
  0xf5   :  { %v520_v25 = vmax.f32 %v488_v21, 0.0 }
  0xf7   :  { %v542_v26 = vpack.c.bf16 %v520_v25, %v519_v24 }
  0xf8   :  { %v348_v27 = vpop.permute.xlu1 %347 }
  0xf9   :  { %v418_v29 = vmul.f32 %v1739_v52, %v348_v27  ;;  %1397 = vmatmul.mubr.msk.bf16.gmra.mxu0 %vm579_vm2, %v542_v26  ;;  %v222_v26 = vpop.permute.xlu0 %221 }
  0xfb   :  { %v450_v8 = vadd.f32 %v418_v29, %v253_v28 }
  0xfc   :  { %v352_v31 = vpop.permute.xlu1 %351 }
  0xfd   :  { %v419_v34 = vmul.f32 %v1739_v52, %v352_v31  ;;  %v489_v35 = vadd.f32 %v1760_v2, %v450_v8  ;;  %v262_v8 = vmul.f32 %v1747_v55, %v217_v51 }
  0xff   :  { %v451_v36 = vadd.f32 %v419_v34, %v254_v33  ;;  %v521_v41 = vmax.f32 %v489_v35, 0.0  ;;  %v388_v33 = vpop.permute.xlu0 %387 }
 0x100   :  { %v428_v37 = vmul.f32 %v1739_v52, %v388_v33 }
 0x101   :  { %v490_v40 = vadd.f32 %v1760_v2, %v451_v36  ;;  %v187_v43 = vpop.permute.xlu1 %186  ;;  %v263_v36 = vmul.f32 %v1747_v55, %v222_v26 }
 0x102   :  { %v256_v53 = vmul.f32 %v1747_v55, %v187_v43 }
 0x103   :  { %v522_v45 = vmax.f32 %v490_v40, 0.0 }
 0x105   :  { %v543_v48 = vpack.c.bf16 %v522_v45, %v521_v41  ;;  %v460_v41 = vadd.f32 %v428_v37, %v263_v36 }
 0x106   :  { %v360_v50 = vpop.permute.xlu1 %359 }
 0x107   :  { %v421_v44 = vmul.f32 %v1739_v52, %v360_v50  ;;  %1400 = vmatprep.mubr.msk.bf16.mxu0 %vm579_vm2, %v543_v48 }
 0x109   :  { %v453_v56 = vadd.f32 %v421_v44, %v256_v53  ;;  %v499_v53 = vadd.f32 %v1760_v2, %v460_v41 }
 0x10b   :  { %v492_v49 = vadd.f32 %v1760_v2, %v453_v56  ;;  %v192_v57 = vpop.permute.xlu1 %191  ;;  %v531_v56 = vmax.f32 %v499_v53, 0.0 }
 0x10c   :  { %v257_v63 = vmul.f32 %v1747_v55, %v192_v57 }
 0x10d   :  { %v524_v59 = vmax.f32 %v492_v49, 0.0 }
 0x10f   :  { %v544_v60 = vpack.c.bf16 %v524_v59, %v523_v58 }
 0x110   :  { %v364_v62 = vpop.permute.xlu1 %363 }
 0x111   :  { %v422_v0 = vmul.f32 %v1739_v52, %v364_v62  ;;  %1401 = vmatmul.mubr.msk.bf16.gmra.mxu0 %vm579_vm2, %v544_v60 }
 0x113   :  { %v454_v32 = vadd.f32 %v422_v0, %v257_v63 }
 0x114   :  { %v368_v1 = vpop.permute.xlu1 %367 }
 0x115   :  { %v423_v5 = vmul.f32 %v1739_v52, %v368_v1  ;;  %v493_v7 = vadd.f32 %v1760_v2, %v454_v32 }
 0x117   :  { %v455_v9 = vadd.f32 %v423_v5, %v258_v4  ;;  %v525_v14 = vmax.f32 %v493_v7, 0.0 }
 0x119   :  { %v494_v12 = vadd.f32 %v1760_v2, %v455_v9  ;;  %v207_v13 = vpop.permute.xlu1 %206 }
 0x11a   :  { %v260_v19 = vmul.f32 %v1747_v55, %v207_v13 }
 0x11b   :  { %v526_v15 = vmax.f32 %v494_v12, 0.0 }
 0x11d   :  { %v545_v16 = vpack.c.bf16 %v526_v15, %v525_v14 }
 0x11e   :  { %v376_v17 = vpop.permute.xlu1 %375 }
 0x11f   :  { %v425_v47 = vmul.f32 %v1739_v52, %v376_v17  ;;  %1404 = vmatprep.mubr.msk.bf16.mxu0 %vm579_vm2, %v545_v16 }
 0x121   :  { %v457_v3 = vadd.f32 %v425_v47, %v260_v19 }
 0x123   :  { %v496_v21 = vadd.f32 %v1760_v2, %v457_v3  ;;  %v212_v22 = vpop.permute.xlu1 %211 }
 0x124   :  { %v261_v18 = vmul.f32 %v1747_v55, %v212_v22 }
 0x125   :  { %v528_v24 = vmax.f32 %v496_v21, 0.0 }
 0x127   :  { %v546_v25 = vpack.c.bf16 %v528_v24, %v527_v23 }
 0x128   :  { %v380_v27 = vpop.permute.xlu1 %379 }
 0x129   :  { %v426_v28 = vmul.f32 %v1739_v52, %v380_v27  ;;  %1405 = vmatmul.mubr.msk.bf16.gmra.mxu0 %vm579_vm2, %v546_v25 }
 0x12b   :  { %v458_v29 = vadd.f32 %v426_v28, %v261_v18 }
 0x12c   :  { %v384_v30 = vpop.permute.xlu1 %383 }
 0x12d   :  { %v427_v31 = vmul.f32 %v1739_v52, %v384_v30  ;;  %v497_v34 = vadd.f32 %v1760_v2, %v458_v29 }
 0x12f   :  { %v459_v35 = vadd.f32 %v427_v31, %v262_v8  ;;  %v529_v40 = vmax.f32 %v497_v34, 0.0 }
 0x131   :  { %v498_v38 = vadd.f32 %v1760_v2, %v459_v35  ;;  %v227_v39 = vpop.permute.xlu1 %226 }
 0x132   :  { %v264_v48 = vmul.f32 %v1747_v55, %v227_v39  ;;  %v1899_v55 = vld [vmem:[%s2051_s4] ss:$0 sm:$0xff] }
 0x133   :  { %v530_v43 = vmax.f32 %v498_v38, 0.0 }
 0x135   :  { %v547_v45 = vpack.c.bf16 %v530_v43, %v529_v40 }
 0x136   :  { %v392_v46 = vpop.permute.xlu1 %391 }
 0x137   :  { %v429_v50 = vmul.f32 %v1739_v52, %v392_v46  ;;  %1408 = vmatprep.mubr.msk.bf16.mxu0 %vm579_vm2, %v547_v45 }
 0x139   :  { %v461_v44 = vadd.f32 %v429_v50, %v264_v48 }
 0x13b   :  { %v500_v54 = vadd.f32 %v1760_v2, %v461_v44 }
 0x13d   :  { %v532_v49 = vmax.f32 %v500_v54, 0.0 }
 0x13f   :  { %v548_v57 = vpack.c.bf16 %v532_v49, %v531_v56 }
 0x141   :  { %1409 = vmatmul.mubr.msk.bf16.gmra.mxu0 %vm579_vm2, %v548_v57 }
 0x170   :  { %v1382_v58 = vpop.f32.mrf.mxu0 }
 0x171   :  { %v678_v62 = vadd.f32 %v1382_v58, %v1899_v55 }
 0x172   :  { %v669_v59 = vpop.f32.mrf.mxu0 }
 0x173   :  { %v670_v60 = vadd.f32 %v1899_v55, %v669_v59  ;;  %v798_v5 = vmax.f32 %v678_v62, 0.0 }
 0x174   :  { %v1383_v52 = vpop.f32.mrf.mxu0 }
 0x175   :  { %v681_v61 = vadd.f32 %v1383_v52, %v1899_v55  ;;  %v796_v1 = vmax.f32 %v670_v60, 0.0 }
 0x176   :  { %v672_v2 = vpop.f32.mrf.mxu0 }
 0x177   :  { %v673_v63 = vadd.f32 %v1899_v55, %v672_v2  ;;  %v799_v0 = vmax.f32 %v681_v61, 0.0 }
 0x178   :  { %v1386_v32 = vpop.f32.mrf.mxu0 }
 0x179   :  { %v797_v4 = vmax.f32 %v673_v63, 0.0  ;;  %v829_v9 = vpack.c.bf16 %v799_v0, %v798_v5  ;;  %v694_v13 = vadd.f32 %v1386_v32, %v1899_v55 }
 0x17a   :  { %v685_v6 = vpop.f32.mrf.mxu0 }
 0x17b   :  { %v828_v7 = vpack.c.bf16 %v797_v4, %v796_v1  ;;  %v686_v11 = vadd.f32 %v1899_v55, %v685_v6  ;;  %v802_v19 = vmax.f32 %v694_v13, 0.0 }
 0x17c   :  { %v1387_v10 = vpop.f32.mrf.mxu0 }
 0x17d   :  { %v697_v12 = vadd.f32 %v1387_v10, %v1899_v55  ;;  %1418 = vmatprep.mubr.msk.bf16.mxu1 %vm579_vm2, %v828_v7  ;;  %v800_v16 = vmax.f32 %v686_v11, 0.0 }
 0x17e   :  { %v688_v14 = vpop.f32.mrf.mxu0  ;;  %1419 = vmatmul.mubr.msk.bf16.vlgmr.msra.gmra.mxu1 %vm579_vm2, %v829_v9 }
 0x17f   :  { %v689_v15 = vadd.f32 %v1899_v55, %v688_v14  ;;  %v803_v42 = vmax.f32 %v697_v12, 0.0 }
 0x181   :  { %v801_v17 = vmax.f32 %v689_v15, 0.0  ;;  %v831_v20 = vpack.c.bf16 %v803_v42, %v802_v19 }
 0x183   :  { %v830_v47 = vpack.c.bf16 %v801_v17, %v800_v16 }
 0x185   :  { %1422 = vmatprep.mubr.msk.bf16.mxu1 %vm579_vm2, %v830_v47 }
 0x186   :  { %1423 = vmatmul.mubr.msk.bf16.gmra.mxu1 %vm579_vm2, %v831_v20 }
 0x189   :  { %v1390_v3 = vpop.f32.mrf.mxu0 }
 0x18a   :  { %v710_v24 = vadd.f32 %v1390_v3, %v1899_v55 }
 0x18b   :  { %v701_v51 = vpop.f32.mrf.mxu0 }
 0x18c   :  { %v702_v22 = vadd.f32 %v1899_v55, %v701_v51  ;;  %v806_v29 = vmax.f32 %v710_v24, 0.0 }
 0x18d   :  { %v1391_v21 = vpop.f32.mrf.mxu0 }
 0x18e   :  { %v713_v23 = vadd.f32 %v1391_v21, %v1899_v55  ;;  %v804_v18 = vmax.f32 %v702_v22, 0.0 }
 0x18f   :  { %v704_v25 = vpop.f32.mrf.mxu0 }
 0x190   :  { %v705_v26 = vadd.f32 %v1899_v55, %v704_v25  ;;  %v807_v27 = vmax.f32 %v713_v23, 0.0 }
 0x192   :  { %v805_v28 = vmax.f32 %v705_v26, 0.0  ;;  %v833_v8 = vpack.c.bf16 %v807_v27, %v806_v29 }
 0x194   :  { %v832_v30 = vpack.c.bf16 %v805_v28, %v804_v18 }
 0x196   :  { %1426 = vmatprep.mubr.msk.bf16.mxu1 %vm579_vm2, %v832_v30 }
 0x197   :  { %1427 = vmatmul.mubr.msk.bf16.gmra.mxu1 %vm579_vm2, %v833_v8 }
 0x1a1   :  { %v1394_v31 = vpop.f32.mrf.mxu0 }
 0x1a2   :  { %v726_v37 = vadd.f32 %v1394_v31, %v1899_v55 }
 0x1a3   :  { %v717_v33 = vpop.f32.mrf.mxu0 }
 0x1a4   :  { %v718_v35 = vadd.f32 %v1899_v55, %v717_v33  ;;  %v810_v45 = vmax.f32 %v726_v37, 0.0 }
 0x1a5   :  { %v1395_v34 = vpop.f32.mrf.mxu0 }
 0x1a6   :  { %v729_v36 = vadd.f32 %v1395_v34, %v1899_v55  ;;  %v808_v43 = vmax.f32 %v718_v35, 0.0 }
 0x1a7   :  { %v720_v38 = vpop.f32.mrf.mxu0 }
 0x1a8   :  { %v721_v39 = vadd.f32 %v1899_v55, %v720_v38  ;;  %v811_v40 = vmax.f32 %v729_v36, 0.0 }
 0x1aa   :  { %v809_v41 = vmax.f32 %v721_v39, 0.0  ;;  %v835_v48 = vpack.c.bf16 %v811_v40, %v810_v45  ;;  %v1952_v40 = vld [vmem:[%s2053_s6] ss:$0 sm:$0xff] }
 0x1ac   :  { %v834_v46 = vpack.c.bf16 %v809_v41, %v808_v43 }
 0x1ae   :  { %1430 = vmatprep.mubr.msk.bf16.mxu1 %vm579_vm2, %v834_v46 }
 0x1af   :  { %1431 = vmatmul.mubr.msk.bf16.gmra.mxu1 %vm579_vm2, %v835_v48 }
 0x1b9   :  { %v1398_v50 = vpop.f32.mrf.mxu0 }
 0x1ba   :  { %v742_v49 = vadd.f32 %v1398_v50, %v1899_v55 }
 0x1bb   :  { %v733_v53 = vpop.f32.mrf.mxu0 }
 0x1bc   :  { %v734_v54 = vadd.f32 %v1899_v55, %v733_v53  ;;  %v814_v61 = vmax.f32 %v742_v49, 0.0 }
 0x1bd   :  { %v1399_v44 = vpop.f32.mrf.mxu0 }
 0x1be   :  { %v745_v56 = vadd.f32 %v1399_v44, %v1899_v55  ;;  %v812_v52 = vmax.f32 %v734_v54, 0.0 }
 0x1bf   :  { %v736_v57 = vpop.f32.mrf.mxu0 }
 0x1c0   :  { %v737_v58 = vadd.f32 %v1899_v55, %v736_v57  ;;  %v815_v59 = vmax.f32 %v745_v56, 0.0 }
 0x1c2   :  { %v813_v60 = vmax.f32 %v737_v58, 0.0  ;;  %v837_v2 = vpack.c.bf16 %v815_v59, %v814_v61 }
 0x1c4   :  { %v836_v62 = vpack.c.bf16 %v813_v60, %v812_v52 }
 0x1c6   :  { %1434 = vmatprep.mubr.msk.bf16.mxu1 %vm579_vm2, %v836_v62 }
 0x1c7   :  { %1435 = vmatmul.mubr.msk.bf16.gmra.mxu1 %vm579_vm2, %v837_v2 }
 0x1d1   :  { %v1402_v63 = vpop.f32.mrf.mxu0 }
 0x1d2   :  { %v758_v5 = vadd.f32 %v1402_v63, %v1899_v55 }
 0x1d3   :  { %v749_v0 = vpop.f32.mrf.mxu0 }
 0x1d4   :  { %v750_v1 = vadd.f32 %v1899_v55, %v749_v0  ;;  %v818_v12 = vmax.f32 %v758_v5, 0.0 }
 0x1d5   :  { %v1403_v32 = vpop.f32.mrf.mxu0 }
 0x1d6   :  { %v761_v4 = vadd.f32 %v1403_v32, %v1899_v55  ;;  %v816_v10 = vmax.f32 %v750_v1, 0.0 }
 0x1d7   :  { %v752_v6 = vpop.f32.mrf.mxu0 }
 0x1d8   :  { %v753_v7 = vadd.f32 %v1899_v55, %v752_v6  ;;  %v819_v9 = vmax.f32 %v761_v4, 0.0 }
 0x1da   :  { %v817_v11 = vmax.f32 %v753_v7, 0.0  ;;  %v839_v14 = vpack.c.bf16 %v819_v9, %v818_v12 }
 0x1dc   :  { %v838_v13 = vpack.c.bf16 %v817_v11, %v816_v10 }
 0x1de   :  { %1438 = vmatprep.mubr.msk.bf16.mxu1 %vm579_vm2, %v838_v13 }
 0x1df   :  { %1439 = vmatmul.mubr.msk.bf16.gmra.mxu1 %vm579_vm2, %v839_v14 }
 0x1e9   :  { %v1406_v15 = vpop.f32.mrf.mxu0 }
 0x1ea   :  { %v774_v47 = vadd.f32 %v1406_v15, %v1899_v55 }
 0x1eb   :  { %v765_v42 = vpop.f32.mrf.mxu0 }
 0x1ec   :  { %v766_v17 = vadd.f32 %v1899_v55, %v765_v42  ;;  %v822_v23 = vmax.f32 %v774_v47, 0.0 }
 0x1ed   :  { %v1407_v16 = vpop.f32.mrf.mxu0 }
 0x1ee   :  { %v777_v19 = vadd.f32 %v1407_v16, %v1899_v55  ;;  %v820_v21 = vmax.f32 %v766_v17, 0.0 }
 0x1ef   :  { %v768_v20 = vpop.f32.mrf.mxu0 }
 0x1f0   :  { %v769_v3 = vadd.f32 %v1899_v55, %v768_v20  ;;  %v823_v51 = vmax.f32 %v777_v19, 0.0 }
 0x1f2   :  { %v821_v22 = vmax.f32 %v769_v3, 0.0  ;;  %v841_v25 = vpack.c.bf16 %v823_v51, %v822_v23 }
 0x1f4   :  { %v840_v24 = vpack.c.bf16 %v821_v22, %v820_v21 }
 0x1f6   :  { %1442 = vmatprep.mubr.msk.bf16.mxu1 %vm579_vm2, %v840_v24 }
 0x1f7   :  { %1443 = vmatmul.mubr.msk.bf16.gmra.mxu1 %vm579_vm2, %v841_v25 }
 0x201   :  { %v1410_v26 = vpop.f32.mrf.mxu0 }
 0x202   :  { %v790_v30 = vadd.f32 %v1410_v26, %v1899_v55 }
 0x203   :  { %v781_v27 = vpop.f32.mrf.mxu0 }
 0x204   :  { %v782_v28 = vadd.f32 %v1899_v55, %v781_v27  ;;  %v826_v36 = vmax.f32 %v790_v30, 0.0  ;;  %v1987_v27 = vld [vmem:[%s2054_s7] sm:$0x1]  ;;  %s1531_s7 = smov [#allocation3]  }
 0x205   :  { %v1411_v18 = vpop.f32.mrf.mxu0  ;;  %1372 = vmatprep.mubr.msk.bf16.mxu0 %vm579_vm2, %v1987_v27  ;;  %s1266_s3 = sshll.u32 %s1531_s7, 4  ;;  %s1267_s3 = int_to_ptr.vmem [resolvable:$true] %s1266_s3 }
 0x206   :  { %v793_v29 = vadd.f32 %v1411_v18, %v1899_v55  ;;  %v824_v34 = vmax.f32 %v782_v28, 0.0  ;;  %v1135_v18 = vld [vmem:[#allocation2] sm:$0x1]  ;;  %s1505_s24 = scalar_lea.vmem %s1267_s3, 32  ;;  %p1510_p1 = scmp.lt.s32.totalorder %s1267_s3, %s1267_s3 }
 0x207   :  { %v784_v8 = vpop.f32.mrf.mxu0  ;;  %1138 = vperm.xlu1 %1497, %v1135_v18   ;;  %p1506_p0 = scmp.ne.s32.totalorder %s1267_s3, %s1505_s24  ;;  %p1511_p2 = scmp.lt.s32.totalorder %s1505_s24, %s1505_s24 }
 0x208   :  { %v785_v31 = vadd.f32 %v1899_v55, %v784_v8  ;;  %v827_v33 = vmax.f32 %v793_v29, 0.0 }
 0x209   :  { %p1512_p3 = por %p1511_p2, %p1510_p1 }
 0x20a   :  { %v825_v35 = vmax.f32 %v785_v31, 0.0  ;;  %v843_v38 = vpack.c.bf16 %v827_v33, %v826_v36 }
 0x20b   :  { %p1513_p4 = pnand %p1512_p3, %p1506_p0 }
 0x20c   :  { %v842_v37 = vpack.c.bf16 %v825_v35, %v824_v34 }
 0x20e   :  { %1446 = vmatprep.mubr.msk.bf16.mxu1 %vm579_vm2, %v842_v37 }
 0x20f   :  { %1447 = vmatmul.mubr.msk.bf16.gmra.mxu1 %vm579_vm2, %v843_v38 }
 0x23e   :  { %v1420_v39 = vpop.f32.mrf.mxu1 }
 0x23f   :  { %v968_v41 = vadd.f32 %v1420_v39, %v1952_v40 }
 0x240   :  { %v959_v43 = vpop.f32.mrf.mxu1 }
 0x241   :  { %v960_v45 = vadd.f32 %v1952_v40, %v959_v43  ;;  %v1088_v50 = vmax.f32 %v968_v41, 0.0 }
 0x242   :  { %v1421_v55 = vpop.f32.mrf.mxu1 }
 0x243   :  { %v971_v46 = vadd.f32 %v1421_v55, %v1952_v40  ;;  %v1086_v56 = vmax.f32 %v960_v45, 0.0 }
 0x244   :  { %v962_v48 = vpop.f32.mrf.mxu1 }
 0x245   :  { %v1089_v53 = vmax.f32 %v971_v46, 0.0  ;;  %v963_v44 = vadd.f32 %v1952_v40, %v962_v48 }
 0x246   :  { %v1424_v54 = vpop.f32.mrf.mxu1 }
 0x247   :  { %v1958_v49 = vpack.c.bf16 %v1089_v53, %v1088_v50  ;;  %v1087_v57 = vmax.f32 %v963_v44, 0.0  ;;  %v984_v52 = vadd.f32 %v1424_v54, %v1952_v40 }
 0x248   :  { %v975_v58 = vpop.f32.mrf.mxu1 }
 0x249   :  { %v1960_v59 = vpack.c.bf16 %v1087_v57, %v1086_v56  ;;  %v976_v61 = vadd.f32 %v1952_v40, %v975_v58  ;;  %v1092_v63 = vmax.f32 %v984_v52, 0.0 }
 0x24a   :  { %v1425_v60 = vpop.f32.mrf.mxu1 }
 0x24b   :  { %v987_v62 = vadd.f32 %v1425_v60, %v1952_v40  ;;  %v1090_v1 = vmax.f32 %v976_v61, 0.0 }
 0x24c   :  { %v978_v2 = vpop.f32.mrf.mxu1 }
 0x24d   :  { %v1093_v0 = vmax.f32 %v987_v62, 0.0  ;;  %v979_v32 = vadd.f32 %v1952_v40, %v978_v2 }
 0x24f   :  { %v1966_v4 = vpack.c.bf16 %v1093_v0, %v1092_v63  ;;  %v1091_v5 = vmax.f32 %v979_v32, 0.0 }
 0x251   :  { %v1968_v6 = vpack.c.bf16 %v1091_v5, %v1090_v1 }
 0x257   :  { %v1970_v7 = vpop.f32.mrf.mxu1 }
 0x259   :  { %v1972_v9 = vpop.f32.mrf.mxu1 }
 0x25b   :  { %v1429_v10 = vpop.f32.mrf.mxu1 }
 0x25c   :  { %v1003_v5 = vadd.f32 %v1429_v10, %v1952_v40 }
 0x25d   :  { %v1974_v11 = vpop.f32.mrf.mxu1 }
 0x25e   :  { %v995_v10 = vadd.f32 %v1952_v40, %v1974_v11 }
 0x26f   :  { %v1432_v12 = vpop.f32.mrf.mxu1 }
 0x270   :  { %v1016_v38 = vadd.f32 %v1432_v12, %v1952_v40 }
 0x271   :  { %v1007_v13 = vpop.f32.mrf.mxu1 }
 0x272   :  { %v1100_v45 = vmax.f32 %v1016_v38, 0.0  ;;  %v1008_v58 = vadd.f32 %v1952_v40, %v1007_v13 }
 0x273   :  { %v1433_v14 = vpop.f32.mrf.mxu1 }
 0x274   :  { %v1019_v36 = vadd.f32 %v1433_v14, %v1952_v40  ;;  %v1098_v32 = vmax.f32 %v1008_v58, 0.0  ;;  %v1000_v14 = vadd.f32 %v1970_v7, %v1952_v40  ;;  %v992_v7 = vadd.f32 %v1952_v40, %v1972_v9 }
 0x275   :  { %v1010_v15 = vpop.f32.mrf.mxu1 }
 0x276   :  { %v1101_v43 = vmax.f32 %v1019_v36, 0.0  ;;  %v1011_v50 = vadd.f32 %v1952_v40, %v1010_v15 }
 0x278   :  { %v1126_v44 = vpack.c.bf16 %v1101_v43, %v1100_v45  ;;  %v1099_v62 = vmax.f32 %v1011_v50, 0.0  ;;  %v1158_v43 = vsel %vm579_vm2, %v1966_v4, 0  ;;  %v1149_v4 = vsel %vm579_vm2, %v1960_v59, 0 }
 0x27a   :  { %v1170_v0 = vsel %vm579_vm2, %v1126_v44, 0  ;;  %v1125_v12 = vpack.c.bf16 %v1099_v62, %v1098_v32 }
 0x287   :  { %v1436_v42 = vpop.f32.mrf.mxu1 }
 0x288   :  { %v1032_v17 = vadd.f32 %v1436_v42, %v1952_v40  ;;  %v1097_v42 = vmax.f32 %v1003_v5, 0.0 }
 0x289   :  { %v1023_v16 = vpop.f32.mrf.mxu1 }
 0x28a   :  { %v1024_v47 = vadd.f32 %v1952_v40, %v1023_v16  ;;  %v1104_v51 = vmax.f32 %v1032_v17, 0.0 }
 0x28b   :  { %v1437_v19 = vpop.f32.mrf.mxu1 }
 0x28c   :  { %v1035_v20 = vadd.f32 %v1437_v19, %v1952_v40  ;;  %v1102_v23 = vmax.f32 %v1024_v47, 0.0  ;;  %v1167_v19 = vsel %vm579_vm2, %v1125_v12, 0  ;;  %v1096_v47 = vmax.f32 %v1000_v14, 0.0 }
 0x28d   :  { %v1026_v3 = vpop.f32.mrf.mxu1 }
 0x28e   :  { %v1105_v21 = vmax.f32 %v1035_v20, 0.0  ;;  %v1027_v22 = vadd.f32 %v1952_v40, %v1026_v3  ;;  %v1124_v3 = vpack.c.bf16 %v1097_v42, %v1096_v47 }
 0x290   :  { %v1980_v24 = vpack.c.bf16 %v1105_v21, %v1104_v51  ;;  %v1103_v25 = vmax.f32 %v1027_v22, 0.0  ;;  %v1095_v22 = vmax.f32 %v995_v10, 0.0  ;;  %v1164_v18 = vsel %vm579_vm2, %v1124_v3, 0 }
 0x292   :  { %v1982_v26 = vpack.c.bf16 %v1103_v25, %v1102_v23 }
 0x29f   :  { %v1440_v28 = vpop.f32.mrf.mxu1 }
 0x2a1   :  { %v1991_v29 = vpop.f32.mrf.mxu1 }
 0x2a3   :  { %v1441_v30 = vpop.f32.mrf.mxu1 }
 0x2a4   :  { %v1051_v23 = vadd.f32 %v1441_v30, %v1952_v40  ;;  %v1040_v30 = vadd.f32 %v1952_v40, %v1991_v29  ;;  %v1141_v29 = vlaneseq }
 0x2a5   :  { %v1993_v8 = vpop.f32.mrf.mxu1 }
 0x2a6   :  { %v1043_v9 = vadd.f32 %v1952_v40, %v1993_v8  ;;  %v1155_v8 = vsel %vm579_vm2, %v1968_v6, 0  ;;  %v1142_v6 = vshrl.u32 %v1141_v29, 7  ;;  %vm1257_vm3 = vcmp.lt.s32.totalorder %v1141_v29, 256 }
 0x2a8   :  { %v1107_v38 = vmax.f32 %v1043_v9, 0.0 }
 0x2b7   :  { %v1444_v31 = vpop.f32.mrf.mxu1 }
 0x2b8   :  { %v1064_v1 = vadd.f32 %v1444_v31, %v1952_v40  ;;  %v1094_v31 = vmax.f32 %v992_v7, 0.0 }
 0x2b9   :  { %v1055_v33 = vpop.f32.mrf.mxu1 }
 0x2ba   :  { %v1112_v15 = vmax.f32 %v1064_v1, 0.0  ;;  %v1056_v20 = vadd.f32 %v1952_v40, %v1055_v33  ;;  %v1048_v33 = vadd.f32 %v1440_v28, %v1952_v40 }
 0x2bb   :  { %v1445_v34 = vpop.f32.mrf.mxu1 }
 0x2bc   :  { %v1067_v2 = vadd.f32 %v1445_v34, %v1952_v40  ;;  %v1110_v21 = vmax.f32 %v1056_v20, 0.0  ;;  %v1123_v34 = vpack.c.bf16 %v1095_v22, %v1094_v31  ;;  %v1108_v11 = vmax.f32 %v1048_v33, 0.0 }
 0x2bd   :  { %v1058_v35 = vpop.f32.mrf.mxu1 }
 0x2be   :  { %v1113_v13 = vmax.f32 %v1067_v2, 0.0  ;;  %v1059_v17 = vadd.f32 %v1952_v40, %v1058_v35  ;;  %v1109_v35 = vmax.f32 %v1051_v23, 0.0 }
 0x2c0   :  { %v1132_v16 = vpack.c.bf16 %v1113_v13, %v1112_v15  ;;  %v1111_v51 = vmax.f32 %v1059_v17, 0.0  ;;  %v1130_v36 = vpack.c.bf16 %v1109_v35, %v1108_v11 }
 0x2c2   :  { %v1131_v25 = vpack.c.bf16 %v1111_v51, %v1110_v21 }
 0x2cf   :  { %v1448_v37 = vpop.f32.mrf.mxu1 }
 0x2d0   :  { %v1080_v41 = vadd.f32 %v1448_v37, %v1952_v40  ;;  %v1161_v37 = vsel %vm579_vm2, %v1123_v34, 0 }
 0x2d1   :  { %v1071_v39 = vpop.f32.mrf.mxu1 }
 0x2d2   :  { %v1072_v46 = vadd.f32 %v1952_v40, %v1071_v39  ;;  %v1116_v54 = vmax.f32 %v1080_v41, 0.0  ;;  %v1106_v39 = vmax.f32 %v1040_v30, 0.0  ;;  %v1143_v41 = vsub.s32 0, %v1142_v6 }
 0x2d3   :  { %v1449_v55 = vpop.f32.mrf.mxu1 }
 0x2d4   :  { %v1083_v48 = vadd.f32 %v1449_v55, %v1952_v40  ;;  %v1114_v52 = vmax.f32 %v1072_v46, 0.0  ;;  %v1129_v28 = vpack.c.bf16 %v1107_v38, %v1106_v39  ;;  %v1530_v55 = vmov 1966171168  }
 0x2d5   :  { %v1074_v53 = vpop.f32.mrf.mxu1  ;;  %v1241_v45 = vunpack.c.l.s4 %v1530_v55 }
 0x2d6   :  { %v1117_v56 = vmax.f32 %v1083_v48, 0.0  ;;  %v1075_v57 = vadd.f32 %v1952_v40, %v1074_v53  ;;  %v1152_v40 = vsel %vm579_vm2, %v1958_v49, 0 }
 0x2d7   :  { %v1242_v48 = vunpack.c.0.s8 %v1241_v45 }
 0x2d8   :  { %v1134_v60 = vpack.c.bf16 %v1117_v56, %v1116_v54  ;;  %v1115_v61 = vmax.f32 %v1075_v57, 0.0 }
 0x2da   :  { %v1133_v63 = vpack.c.bf16 %v1115_v61, %v1114_v52  ;;  %1450 = vmatprep.subr.msk.bf16.mxu0 %vm579_vm2, %v1134_v60 }
 0x2db   :  { %1357 = vmatpush3.bf16.xpose.msra.mxu0 %v1170_v0 }
 0x2dc   :  { %1451 = vmatprep.subr.msk.bf16.mxu0 %vm579_vm2, %v1133_v63 }
 0x2e3   :  { %1359 = vmatpush3.bf16.xpose.msra.mxu0 %v1167_v19 }
 0x2e4   :  { %1452 = vmatprep.subr.msk.bf16.mxu0 %vm579_vm2, %v1132_v16 }
 0x2eb   :  { %1361 = vmatpush3.bf16.xpose.msra.mxu0 %v1164_v18 }
 0x2ec   :  { %1453 = vmatprep.subr.msk.bf16.mxu0 %vm579_vm2, %v1131_v25 }
 0x2f3   :  { %1363 = vmatpush3.bf16.xpose.msra.mxu0 %v1161_v37 }
 0x2f4   :  { %1454 = vmatprep.subr.msk.bf16.mxu0 %vm579_vm2, %v1130_v36 }
 0x2fb   :  { %1365 = vmatpush3.bf16.xpose.msra.mxu0 %v1158_v43 }
 0x2fc   :  { %1455 = vmatprep.subr.msk.bf16.mxu0 %vm579_vm2, %v1129_v28 }
 0x303   :  { %1367 = vmatpush3.bf16.xpose.msra.mxu0 %v1155_v8 }
 0x304   :  { %1456 = vmatprep.subr.msk.bf16.mxu0 %vm579_vm2, %v1980_v24  ;;  %v1139_v24 = vpop.permute.xlu1 %1138 }
 0x305   :  { %v1144_v46 = vrot.slane %v1139_v24, %v1143_v41 }
 0x30b   :  { %1369 = vmatpush3.bf16.xpose.msra.mxu0 %v1152_v40 }
 0x30c   :  { %1457 = vmatprep.subr.msk.bf16.mxu0 %vm579_vm2, %v1982_v26  ;;  %v1245_v26 = vsub.s32 %v1242_v48, %v1142_v6 }
 0x313   :  { %1371 = vmatpush3.bf16.xpose.msra.mxu0 %v1149_v4 }
 0x31a   :  { %1373 = vmatmul.mubr.msk.bf16.vlgmr.msra.gmra.mxu0 %vm579_vm2, %v1987_v27 }
 0x3da   :  { %v1230_v49 = vpop.f32.mrf.mxu0 }
 0x3db   :  { %v1231_v53 = vadd.f32 %v1230_v49, %v1144_v46 }
 0x3dc   :  { %v1232_v50 = vpop.f32.mrf.mxu0 }
 0x3dd   :  { %v1233_v44 = vadd.f32 %v1232_v50, %v1144_v46 }
 0x3de   :  { %v1234_v54 = vpop.f32.mrf.mxu0 }
 0x3df   :  { %v1239_v56 = vcombine.low %v1231_v53, %v1233_v44 }
 0x3e0   :  { %v1235_v59 = vpop.f32.mrf.mxu0 }
 0x3e1   :  { %v1246_v57 = vrot.slane %v1239_v56, %v1245_v26 }
 0x3e3   :  { %v1253_v27 = vrot.slane %v1246_v57, %v1245_v26 }
 0x3e5   :  { %1259 = vst.msk [vmem:[#allocation3] sm:$0x3] %vm1257_vm3, %v1253_v27 }
 0x3e6   :  { %1516 = shalt.err (!%p1513_p4)
}
 0x3e7   :  { %1269 = dma.vmem_to_hbm [thread:$0]  %s1267_s3, 32, %s2056_s9, [#allocation4]  }
 0x3e8   :  { %1525 = dma.done.wait [#allocation4], 32  }
 0x3e9   :  { %1526 = vsyncadd [#allocation4], 4294967264 }
 0x3ea   :  { %1273 = vsyncpa [#allocation4], 1 }

</bundles_post_ra>
